<compile_context>
chip_gen: v5e
topology: v5e:2x2
jax: 0.10.0
libtpu: 0.0.40
codegen_flags: <defaults>
</compile_context>

<pallas_src>
import jax
import jax.numpy as jnp
from jax.experimental import pallas as pl
from jax.experimental.pallas import tpu as pltpu


def _round_up(a, b):
    return (a + b - 1) // b * b


def _mish_gate(a, b):
    """a * mish(b) with f32 inputs; returns bf16 for the down-projection MXU pass.

    mish(b) = b * tanh(softplus(b)) = b * (s^2 - 1) / (s^2 + 1), s = 1 + e^b.
    One exp + one approx reciprocal instead of exp/log/tanh.  The exp argument
    is clamped at 20: for b >= ~9 the ratio already rounds to 1.0 in f32, so
    mish(b) == b there and no extra compare/select is needed.
    """
    s = 1.0 + jnp.exp(jnp.minimum(b, 20.0))
    s2 = s * s
    mish_b = b * (s2 - 1.0) * pl.reciprocal(s2 + 1.0, approx=True)
    return (a * mish_b).astype(jnp.bfloat16)


def _time_mix(x_ref, xx_ref, mix_ref):
    # mix rows: [time_mix_k, 1 - time_mix_k, time_mix_r, 1 - time_mix_r]
    x = x_ref[...].astype(jnp.float32)
    xx = xx_ref[...].astype(jnp.float32)
    xa = x * mix_ref[0:1, :] + xx * mix_ref[1:2, :]
    xb = x * mix_ref[2:3, :] + xx * mix_ref[3:4, :]
    return xa.astype(jnp.bfloat16), xb.astype(jnp.bfloat16)


def mishglu_resident_kernel(x_ref, xx_ref, mix_ref, aa_ref, bb_ref, vw_ref, o_ref):
    # Weights are VMEM-resident (constant index maps); one step does all of F.
    xa, xb = _time_mix(x_ref, xx_ref, mix_ref)
    a = jnp.dot(xa, aa_ref[...], preferred_element_type=jnp.float32)
    b = jnp.dot(xb, bb_ref[...], preferred_element_type=jnp.float32)
    gated = _mish_gate(a, b)
    o_ref[...] = jnp.dot(gated, vw_ref[...],
                         preferred_element_type=jnp.float32).astype(o_ref.dtype)


def mishglu_tiled_kernel(x_ref, xx_ref, mix_ref, aa_ref, bb_ref, vw_ref, o_ref,
                         xa_ref, xb_ref):
    f = pl.program_id(1)

    # Init the resident f32 output block and hoist the time-mixing out of the
    # F loop: computed once per row tile (f == 0), reused for every F tile.
    @pl.when(f == 0)
    def _():
        o_ref[...] = jnp.zeros_like(o_ref)
        xa, xb = _time_mix(x_ref, xx_ref, mix_ref)
        xa_ref[...] = xa
        xb_ref[...] = xb

    a = jnp.dot(xa_ref[...], aa_ref[...], preferred_element_type=jnp.float32)
    b = jnp.dot(xb_ref[...], bb_ref[...], preferred_element_type=jnp.float32)
    gated = _mish_gate(a, b)
    # Output block index ignores f -> the f32 output block is resident across
    # the F reduction axis; accumulate directly into it (no scratch acc).
    o_ref[...] += jnp.dot(gated, vw_ref[...], preferred_element_type=jnp.float32)


def _select_defaults():
    """Generation-aware (tm, tf, vmem_limit_bytes)."""
    mib = 1024 * 1024
    vmem_cap = 64 * mib                   # conservative fallback
    try:
        vmem_cap = int(pltpu.get_tpu_info().vmem_capacity_bytes)
    except Exception:
        pass
    kind = ""
    try:
        kind = jax.devices()[0].device_kind.lower()
    except Exception:
        pass
    if vmem_cap <= 64 * mib:
        # v7x-class: 64 MiB VMEM / TC, ~3.2 TB/s HBM -> knee ~310 FLOP/byte.
        # Leave headroom for Mosaic internal scratch.
        tm, vmem_limit = 512, min(int(0.85 * vmem_cap), 56 * mib)
    elif "v6" in kind:
        # v6e: ~680 FLOP/byte knee -> big row tiles; 128 MiB VMEM allows it.
        tm, vmem_limit = 768, min(int(0.80 * vmem_cap), 104 * mib)
    elif "v5" in kind:
        # v5e: mem-bound knee ~240 FLOP/byte; tm=256 already sits at it and a
        # smaller tm keeps the (tm, tf) f32 intermediates off the single vst slot.
        tm, vmem_limit = 256, min(int(0.80 * vmem_cap), 100 * mib)
    else:
        tm, vmem_limit = 512, min(int(0.80 * vmem_cap), 96 * mib)
    return tm, 512, vmem_limit


def _pick_tf(F, tf_target):
    """Return (tf, F_pad): tf divides F_pad, F_pad >= F, tf lane-friendly."""
    tf_target = max(128, (tf_target // 128) * 128)
    if F <= tf_target:
        return F, F
    for cand in range(tf_target, 127, -128):
        if F % cand == 0:
            return cand, F
    # No multiple-of-128 divisor <= target: zero-pad F (padded columns are
    # harmless -- mish(0) == 0 and the padded value-weight rows are zero).
    return tf_target, _round_up(F, tf_target)


def mishglu_forward(x, time_mix_k, time_mix_r, aa_w, bb_w, value_w, *,
                    tm=None, tf=None, vmem_limit_bytes=None, force_tiled=False):
    """x: (B, T, C).  aa_w/bb_w: (dim_ffn, C) torch layout.  value_w: (C, dim_ffn)."""
    B, T, C = x.shape
    F = aa_w.shape[0]

    tm_def, tf_def, vmem_def = _select_defaults()
    tm = tm_def if tm is None else tm
    tf = tf_def if tf is None else tf
    vmem_limit_bytes = vmem_def if vmem_limit_bytes is None else vmem_limit_bytes

    # time_shift: xx[:, 0] = 0 ; xx[:, t] = x[:, t-1].  Done on the bf16 tensor
    # so the pad and the cast fuse into a single pass.
    # TODO(synk): derive the shifted rows inside the kernel (overlapping window
    # of x + batch-boundary zeroing) to halve the activation read DMA entirely.
    x_bf = x.astype(jnp.bfloat16)
    xx_bf = jnp.pad(x_bf, ((0, 0), (1, 0), (0, 0)))[:, :T, :]

    M = B * T
    tm_eff = min(_round_up(tm, 8), _round_up(M, 8))
    M_pad = _round_up(M, tm_eff)

    x2 = x_bf.reshape(M, C)
    xx2 = xx_bf.reshape(M, C)
    if M_pad != M:
        pad = ((0, M_pad - M), (0, 0))
        x2 = jnp.pad(x2, pad)
        xx2 = jnp.pad(xx2, pad)

    # Fold the four per-channel mix vectors into one (4, C) block.
    tmk = time_mix_k.reshape(1, C).astype(jnp.float32)
    tmr = time_mix_r.reshape(1, C).astype(jnp.float32)
    mix = jnp.concatenate([tmk, 1.0 - tmk, tmr, 1.0 - tmr], axis=0)

    aa_t = aa_w.T.astype(jnp.bfloat16)      # (C, F)
    bb_t = bb_w.T.astype(jnp.bfloat16)      # (C, F)
    vw_t = value_w.T.astype(jnp.bfloat16)   # (F, C)

    # Weight-resident fast path: bf16 weights + f32 (tm, F) intermediates fit
    # well inside the VMEM budget -> weights never re-streamed per row tile.
    weight_bytes = 3 * C * F * 2
    interm_bytes = 2 * tm_eff * F * 4
    resident = (not force_tiled) and (
        weight_bytes + interm_bytes <= int(0.45 * vmem_limit_bytes))

    if resident:
        out2 = pl.pallas_call(
            mishglu_resident_kernel,
            out_shape=jax.ShapeDtypeStruct((M_pad, C), x.dtype),
            grid_spec=pltpu.PrefetchScalarGridSpec(
                num_scalar_prefetch=0,
                grid=(M_pad // tm_eff,),
                in_specs=[
                    pl.BlockSpec((tm_eff, C), lambda i: (i, 0)),   # x rows
                    pl.BlockSpec((tm_eff, C), lambda i: (i, 0)),   # xx rows
                    pl.BlockSpec((4, C), lambda i: (0, 0)),        # mix factors
                    pl.BlockSpec((C, F), lambda i: (0, 0)),        # aa weight (resident)
                    pl.BlockSpec((C, F), lambda i: (0, 0)),        # bb weight (resident)
                    pl.BlockSpec((F, C), lambda i: (0, 0)),        # value weight (resident)
                ],
                out_specs=pl.BlockSpec((tm_eff, C), lambda i: (i, 0))),
            compiler_params=pltpu.CompilerParams(
                dimension_semantics=("parallel",),
                vmem_limit_bytes=int(vmem_limit_bytes)),
        )(x2, xx2, mix, aa_t, bb_t, vw_t)
        return out2[:M].reshape(B, T, C)

    # F-tiled reduction path.
    tf_eff, F_pad = _pick_tf(F, tf)
    if F_pad != F:
        aa_t = jnp.pad(aa_t, ((0, 0), (0, F_pad - F)))
        bb_t = jnp.pad(bb_t, ((0, 0), (0, F_pad - F)))
        vw_t = jnp.pad(vw_t, ((0, F_pad - F), (0, 0)))

    grid = (M_pad // tm_eff, F_pad // tf_eff)

    out2 = pl.pallas_call(
        mishglu_tiled_kernel,
        out_shape=jax.ShapeDtypeStruct((M_pad, C), jnp.float32),
        grid_spec=pltpu.PrefetchScalarGridSpec(
            num_scalar_prefetch=0,
            grid=grid,
            in_specs=[
                pl.BlockSpec((tm_eff, C), lambda i, f: (i, 0)),     # x rows
                pl.BlockSpec((tm_eff, C), lambda i, f: (i, 0)),     # xx rows
                pl.BlockSpec((4, C), lambda i, f: (0, 0)),          # mix factors
                pl.BlockSpec((C, tf_eff), lambda i, f: (0, f)),     # aa weight (C, F)
                pl.BlockSpec((C, tf_eff), lambda i, f: (0, f)),     # bb weight (C, F)
                pl.BlockSpec((tf_eff, C), lambda i, f: (f, 0)),     # value weight (F, C)
            ],
            out_specs=pl.BlockSpec((tm_eff, C), lambda i, f: (i, 0)),
            scratch_shapes=[
                pltpu.VMEM((tm_eff, C), jnp.bfloat16),  # hoisted mixed xa
                pltpu.VMEM((tm_eff, C), jnp.bfloat16),  # hoisted mixed xb
            ]),
        compiler_params=pltpu.CompilerParams(
            dimension_semantics=("parallel", "arbitrary"),
            vmem_limit_bytes=int(vmem_limit_bytes)),
    )(x2, xx2, mix, aa_t, bb_t, vw_t)

    return out2[:M].astype(x.dtype).reshape(B, T, C)


def mishglu_reference(x, time_mix_k, time_mix_r, aa_w, bb_w, value_w):
    B, T, C = x.shape
    xx = jnp.pad(x, ((0, 0), (1, 0), (0, 0)))[:, :T, :]
    tmk = time_mix_k.reshape(1, 1, C)
    tmr = time_mix_r.reshape(1, 1, C)
    xa = x * tmk + xx * (1 - tmk)
    xb = x * tmr + xx * (1 - tmr)
    a = xa @ aa_w.T
    b = xb @ bb_w.T
    mish_b = b * jnp.tanh(jax.nn.softplus(b))
    return (a * mish_b) @ value_w.T


def _make_params(key, n_embd, dim_ffn, layer_id, n_layers):
    ratio_1_to_almost0 = 1.0 - layer_id / n_layers
    ramp = jnp.arange(n_embd, dtype=jnp.float32) / n_embd
    time_mix_k = jnp.power(ramp, ratio_1_to_almost0)            # (C,)
    time_mix_r = jnp.power(ramp, ratio_1_to_almost0)            # (C,)
    k1, k2, k3 = jax.random.split(key, 3)
    aa_w = jax.random.normal(k1, (dim_ffn, n_embd), jnp.float32) * 0.1     # Linear(C->F).weight
    bb_w = jax.random.normal(k2, (dim_ffn, n_embd), jnp.float32) * 0.1     # Linear(C->F).weight
    value_w = jax.random.normal(k3, (n_embd, dim_ffn), jnp.float32) * 0.1  # Linear(F->C).weight
    return time_mix_k, time_mix_r, aa_w, bb_w, value_w


def _check(out, ref):
    # bf16 MXU inputs (f32 accumulation) + approx reciprocal loosen tolerance.
    err = float(jnp.max(jnp.abs(out - ref)))
    scale = float(jnp.max(jnp.abs(ref))) + 1e-6
    assert err / scale < 3e-2, (err, scale)


if __name__ == "__main__":
    key = jax.random.PRNGKey(0)
    kp1, kx1, kp2, kx2 = jax.random.split(key, 4)

    # --- Path 1: weight-resident (weights fit VMEM) ---
    B, T, C, Fdim = 2, 8, 32, 128
    tmk, tmr, aa_w, bb_w, value_w = _make_params(kp1, C, Fdim, layer_id=1, n_layers=4)
    x = jax.random.normal(kx1, (B, T, C), jnp.float32)
    out = jax.block_until_ready(mishglu_forward(x, tmk, tmr, aa_w, bb_w, value_w))
    assert out.shape == (B, T, C)
    _check(out, mishglu_reference(x, tmk, tmr, aa_w, bb_w, value_w))

    # --- Path 2: F-tiled reduction (forced; multiple row tiles and F tiles) ---
    B, T, C, Fdim = 4, 16, 32, 256
    tmk, tmr, aa_w, bb_w, value_w = _make_params(kp2, C, Fdim, layer_id=2, n_layers=4)
    x = jax.random.normal(kx2, (B, T, C), jnp.float32)
    out = jax.block_until_ready(
        mishglu_forward(x, tmk, tmr, aa_w, bb_w, value_w,
                        tm=32, tf=128, force_tiled=True))
    assert out.shape == (B, T, C)
    _check(out, mishglu_reference(x, tmk, tmr, aa_w, bb_w, value_w))

    print("KERNEL_OK")
</pallas_src>

<mosaic_0001>
module attributes {stable_mosaic.version = 11 : i64} {
  func.func @mishglu_resident_kernel(%arg0: i32, %arg1: memref<16x32xbf16, #tpu.memory_space<vmem>>, %arg2: memref<16x32xbf16, #tpu.memory_space<vmem>>, %arg3: memref<4x32xf32, #tpu.memory_space<vmem>>, %arg4: memref<32x128xbf16, #tpu.memory_space<vmem>>, %arg5: memref<32x128xbf16, #tpu.memory_space<vmem>>, %arg6: memref<128x32xbf16, #tpu.memory_space<vmem>>, %arg7: memref<16x32xf32, #tpu.memory_space<vmem>>) attributes {dimension_semantics = [#tpu.dimension_semantics<parallel>], iteration_bounds = array<i64: 1>, scalar_prefetch = 0 : i64, scratch_operands = 0 : i64, tpu.core_type = #tpu.core_type<tc>, window_params = [{transform_indices = @transform_0, window_bounds = array<i64: 16, 32>}, {transform_indices = @transform_1, window_bounds = array<i64: 16, 32>}, {pipeline_mode = #tpu.pipeline_mode<synchronous>, transform_indices = @transform_2, window_bounds = array<i64: 4, 32>}, {pipeline_mode = #tpu.pipeline_mode<synchronous>, transform_indices = @transform_3, window_bounds = array<i64: 32, 128>}, {pipeline_mode = #tpu.pipeline_mode<synchronous>, transform_indices = @transform_4, window_bounds = array<i64: 32, 128>}, {pipeline_mode = #tpu.pipeline_mode<synchronous>, transform_indices = @transform_5, window_bounds = array<i64: 128, 32>}, {transform_indices = @transform_6, window_bounds = array<i64: 16, 32>}]} {
    %c0 = arith.constant 0 : index
    %c0_0 = arith.constant 0 : index
    %0 = vector.load %arg1[%c0, %c0_0] : memref<16x32xbf16, #tpu.memory_space<vmem>>, vector<16x32xbf16>
    %1 = arith.extf %0 : vector<16x32xbf16> to vector<16x32xf32>
    %c0_1 = arith.constant 0 : index
    %c0_2 = arith.constant 0 : index
    %2 = vector.load %arg2[%c0_1, %c0_2] : memref<16x32xbf16, #tpu.memory_space<vmem>>, vector<16x32xbf16>
    %3 = arith.extf %2 : vector<16x32xbf16> to vector<16x32xf32>
    %c0_3 = arith.constant 0 : index
    %c0_4 = arith.constant 0 : index
    %4 = vector.load %arg3[%c0_3, %c0_4] : memref<4x32xf32, #tpu.memory_space<vmem>>, vector<1x32xf32>
    %5 = vector.broadcast %4 : vector<1x32xf32> to vector<16x32xf32>
    %6 = arith.mulf %1, %5 : vector<16x32xf32>
    %c1 = arith.constant 1 : index
    %c0_5 = arith.constant 0 : index
    %7 = vector.load %arg3[%c1, %c0_5] : memref<4x32xf32, #tpu.memory_space<vmem>>, vector<1x32xf32>
    %8 = vector.broadcast %7 : vector<1x32xf32> to vector<16x32xf32>
    %9 = arith.mulf %3, %8 : vector<16x32xf32>
    %10 = arith.addf %6, %9 : vector<16x32xf32>
    %c2 = arith.constant 2 : index
    %c0_6 = arith.constant 0 : index
    %11 = vector.load %arg3[%c2, %c0_6] : memref<4x32xf32, #tpu.memory_space<vmem>>, vector<1x32xf32>
    %12 = vector.broadcast %11 : vector<1x32xf32> to vector<16x32xf32>
    %13 = arith.mulf %1, %12 : vector<16x32xf32>
    %c3 = arith.constant 3 : index
    %c0_7 = arith.constant 0 : index
    %14 = vector.load %arg3[%c3, %c0_7] : memref<4x32xf32, #tpu.memory_space<vmem>>, vector<1x32xf32>
    %15 = vector.broadcast %14 : vector<1x32xf32> to vector<16x32xf32>
    %16 = arith.mulf %3, %15 : vector<16x32xf32>
    %17 = arith.addf %13, %16 : vector<16x32xf32>
    %18 = arith.truncf %10 : vector<16x32xf32> to vector<16x32xbf16>
    %19 = arith.truncf %17 : vector<16x32xf32> to vector<16x32xbf16>
    %c0_8 = arith.constant 0 : index
    %c0_9 = arith.constant 0 : index
    %20 = vector.load %arg4[%c0_8, %c0_9] : memref<32x128xbf16, #tpu.memory_space<vmem>>, vector<32x128xbf16>
    %cst = arith.constant dense<0.000000e+00> : vector<16x128xf32>
    %21 = tpu.matmul %18, %20, %cst {dimension_numbers = #tpu.dot_dimension_numbers<[1], [0], [0], [1], [0, 0, 1, 1], [], []>} : vector<16x32xbf16>, vector<32x128xbf16>, vector<16x128xf32> -> vector<16x128xf32>
    %c0_10 = arith.constant 0 : index
    %c0_11 = arith.constant 0 : index
    %22 = vector.load %arg5[%c0_10, %c0_11] : memref<32x128xbf16, #tpu.memory_space<vmem>>, vector<32x128xbf16>
    %cst_12 = arith.constant dense<0.000000e+00> : vector<16x128xf32>
    %23 = tpu.matmul %19, %22, %cst_12 {dimension_numbers = #tpu.dot_dimension_numbers<[1], [0], [0], [1], [0, 0, 1, 1], [], []>} : vector<16x32xbf16>, vector<32x128xbf16>, vector<16x128xf32> -> vector<16x128xf32>
    %cst_13 = arith.constant 2.000000e+01 : f32
    %24 = vector.broadcast %cst_13 : f32 to vector<16x128xf32>
    %25 = arith.minimumf %23, %24 : vector<16x128xf32>
    %26 = math.exp %25 : vector<16x128xf32>
    %cst_14 = arith.constant 1.000000e+00 : f32
    %27 = vector.broadcast %cst_14 : f32 to vector<16x128xf32>
    %28 = arith.addf %27, %26 : vector<16x128xf32>
    %29 = arith.mulf %28, %28 : vector<16x128xf32>
    %cst_15 = arith.constant 1.000000e+00 : f32
    %30 = vector.broadcast %cst_15 : f32 to vector<16x128xf32>
    %31 = arith.subf %29, %30 : vector<16x128xf32>
    %32 = arith.mulf %23, %31 : vector<16x128xf32>
    %cst_16 = arith.constant 1.000000e+00 : f32
    %33 = vector.broadcast %cst_16 : f32 to vector<16x128xf32>
    %34 = arith.addf %29, %33 : vector<16x128xf32>
    %35 = tpu.reciprocal %34 {approx = true} : vector<16x128xf32> -> vector<16x128xf32>
    %36 = arith.mulf %32, %35 : vector<16x128xf32>
    %37 = arith.mulf %21, %36 : vector<16x128xf32>
    %38 = arith.truncf %37 : vector<16x128xf32> to vector<16x128xbf16>
    %c0_17 = arith.constant 0 : index
    %c0_18 = arith.constant 0 : index
    %39 = vector.load %arg6[%c0_17, %c0_18] : memref<128x32xbf16, #tpu.memory_space<vmem>>, vector<128x32xbf16>
    %cst_19 = arith.constant dense<0.000000e+00> : vector<16x32xf32>
    %40 = tpu.matmul %38, %39, %cst_19 {dimension_numbers = #tpu.dot_dimension_numbers<[1], [0], [0], [1], [0, 0, 1, 1], [], []>} : vector<16x128xbf16>, vector<128x32xbf16>, vector<16x32xf32> -> vector<16x32xf32>
    %c0_20 = arith.constant 0 : index
    %c0_21 = arith.constant 0 : index
    %41 = vector.load %arg7[%c0_20, %c0_21] : memref<16x32xf32, #tpu.memory_space<vmem>>, vector<16x32xf32>
    tpu.vector_store %arg7[%c0_20, %c0_21], %40 {strides = array<i32>} : memref<16x32xf32, #tpu.memory_space<vmem>>, vector<16x32xf32>,
    return
  }
  func.func @transform_0(%arg0: i32) -> (i32, i32) {
    %c0_i32 = arith.constant 0 : i32
    %c0_i32_0 = arith.constant 0 : i32
    return %arg0, %c0_i32 : i32, i32
  }
  func.func @transform_1(%arg0: i32) -> (i32, i32) {
    %c0_i32 = arith.constant 0 : i32
    %c0_i32_0 = arith.constant 0 : i32
    return %arg0, %c0_i32 : i32, i32
  }
  func.func @transform_2(%arg0: i32) -> (i32, i32) {
    %c0_i32 = arith.constant 0 : i32
    %c0_i32_0 = arith.constant 0 : i32
    %c0_i32_1 = arith.constant 0 : i32
    return %c0_i32, %c0_i32_0 : i32, i32
  }
  func.func @transform_3(%arg0: i32) -> (i32, i32) {
    %c0_i32 = arith.constant 0 : i32
    %c0_i32_0 = arith.constant 0 : i32
    %c0_i32_1 = arith.constant 0 : i32
    return %c0_i32, %c0_i32_0 : i32, i32
  }
  func.func @transform_4(%arg0: i32) -> (i32, i32) {
    %c0_i32 = arith.constant 0 : i32
    %c0_i32_0 = arith.constant 0 : i32
    %c0_i32_1 = arith.constant 0 : i32
    return %c0_i32, %c0_i32_0 : i32, i32
  }
  func.func @transform_5(%arg0: i32) -> (i32, i32) {
    %c0_i32 = arith.constant 0 : i32
    %c0_i32_0 = arith.constant 0 : i32
    %c0_i32_1 = arith.constant 0 : i32
    return %c0_i32, %c0_i32_0 : i32, i32
  }
  func.func @transform_6(%arg0: i32) -> (i32, i32) {
    %c0_i32 = arith.constant 0 : i32
    %c0_i32_0 = arith.constant 0 : i32
    return %arg0, %c0_i32 : i32, i32
  }
}

</mosaic_0001>

<bundles_post_ra>
// kernel: tpu_custom_call.1
= control target key start
LH: loop header
LB: loop body
LE: loop exit
PB: predicated region body
PF: predicated region fallthrough
CT: control target
= control target key end

     0   :  { %s455_s0 = inlined_call_operand.vmem [shape: bf16[16,32], index: 0, kind: input, shape index: {}]   ;;  %s456_s1 = inlined_call_operand.vmem [shape: bf16[16,32], index: 1, kind: input, shape index: {}]   ;;  %s457_s2 = inlined_call_operand.vmem [shape: f32[4,32], index: 2, kind: input, shape index: {}]   ;;  %s458_s3 = inlined_call_operand.vmem [shape: bf16[32,128], index: 3, kind: input, shape index: {}]   ;;  %s459_s4 = inlined_call_operand.vmem [shape: bf16[32,128], index: 4, kind: input, shape index: {}]   ;;  %s460_s5 = inlined_call_operand.vmem [shape: bf16[128,32], index: 5, kind: input, shape index: {}]   ;;  %s461_s6 = inlined_call_operand.hbm [shape: f32[16,32], index: 6, kind: output, shape index: {}]  }
   0x1   :  { %v298_v0 = vld [vmem:[%s459_s4 + $0x8] sm:$0xff]  ;;  %v297_v1 = vld [vmem:[%s459_s4] sm:$0xff] }
   0x2   :  { %v308_v2 = vld [vmem:[%s455_s0] sm:$0xff]   ;;  %114 = vmatpush.bf16.msra.mxu1 %v298_v0  ;;  %v296_v10 = vld [vmem:[%s458_s3 + $0x8] sm:$0xff] }
   0x3   :  { %v309_v3 = vunpack.c.l.bf16 %v308_v2  ;;  %v310_v4 = vunpack.c.h.bf16 %v308_v2  ;;  %v312_v5 = vld [vmem:[%s456_s1] sm:$0xff]   ;;  %81 = vmatpush.bf16.msra.mxu0 %v296_v10 }
   0x4   :  { %v318_v6 = vld [vmem:[%s457_s2 + $0x2] ss:$0 sm:$0xff]  ;;  %v313_v7 = vunpack.c.l.bf16 %v312_v5  ;;  %v314_v8 = vunpack.c.h.bf16 %v312_v5  ;;  %v319_v9 = vld [vmem:[%s457_s2 + $0x3] ss:$0 sm:$0xff]  ;;  %v320_v14 = vld [vmem:[%s457_s2] ss:$0 sm:$0xff] }
   0x5   :  { %v45_v11 = vmul.f32 %v318_v6, %v309_v3  ;;  %v46_v12 = vmul.f32 %v318_v6, %v310_v4  ;;  %v295_v13 = vld [vmem:[%s458_s3] sm:$0xff] }
   0x6   :  { %v49_v15 = vmul.f32 %v319_v9, %v313_v7  ;;  %v50_v16 = vmul.f32 %v319_v9, %v314_v8  ;;  %v321_v17 = vld [vmem:[%s457_s2 + $0x1] ss:$0 sm:$0xff] }
   0x7   :  { %11 = vsyncpa [#allocation3], 0  ;;  %v35_v18 = vmul.f32 %v320_v14, %v309_v3  ;;  %v36_v19 = vmul.f32 %v320_v14, %v310_v4  ;;  %115 = vmatpush.bf16.msra.mxu1 %v297_v1  ;;  %v39_v22 = vmul.f32 %v321_v17, %v313_v7  ;;  %v40_v23 = vmul.f32 %v321_v17, %v314_v8  ;;  %v306_v28 = vld [vmem:[%s460_s5 + $0x38] sm:$0xff]  ;;  %v305_v29 = vld [vmem:[%s460_s5 + $0x30] sm:$0xff]  ;;  %s231_s7 = sshll.u32 %s461_s6, 4  ;;  %s357_s8 = smov 128   ;;  %s232_s7 = int_to_ptr.hbm [resolvable:$true] %s231_s7 }
   0x8   :  { %v51_v20 = vadd.f32 %v49_v15, %v45_v11  ;;  %v52_v21 = vadd.f32 %v50_v16, %v46_v12  ;;  %vm71_vm0 = vcmask 261120   ;;  %82 = vmatpush.bf16.msra.mxu0 %v295_v13  ;;  %209 = vmatpush.bf16.msra.mxu2 %v306_v28  ;;  %v304_v30 = vld [vmem:[%s460_s5 + $0x28] sm:$0xff]  ;;  %v303_v31 = vld [vmem:[%s460_s5 + $0x20] sm:$0xff]  ;;  %v302_v32 = vld [vmem:[%s460_s5 + $0x18] sm:$0xff]  ;;  %s358_s4 = smov 8  }
   0x9   :  { %v41_v25 = vadd.f32 %v39_v22, %v35_v18  ;;  %v42_v26 = vadd.f32 %v40_v23, %v36_v19  ;;  %v301_v33 = vld [vmem:[%s460_s5 + $0x10] sm:$0xff]  ;;  %v300_v34 = vld [vmem:[%s460_s5 + $0x8] sm:$0xff]  ;;  %v299_v37 = vld [vmem:[%s460_s5] sm:$0xff]  ;;  %s356_s5 = smov [#allocation2]  }
   0xa   :  { %v54_v24 = vpack.c.bf16 %v52_v21, %v51_v20  ;;  %s229_s28 = sshll.u32 %s356_s5, 4  ;;  %s230_s28 = int_to_ptr.vmem [resolvable:$true] %s229_s28 }
   0xb   :  { %v53_v27 = vpack.c.bf16 %v42_v26, %v41_v25 }
   0xc   :  { %260 = vmatmul.msk.bf16.vlgmr.msra.gmra.mxu1 %vm71_vm0, %v54_v24  ;;  %210 = vmatpush.bf16.msra.mxu2 %v305_v29 }
   0xd   :  { %251 = vmatmul.msk.bf16.vlgmr.msra.gmra.mxu0 %vm71_vm0, %v53_v27 }
  0x10   :  { %211 = vmatpush.bf16.msra.mxu2 %v304_v30 }
  0x14   :  { %212 = vmatpush.bf16.msra.mxu2 %v303_v31 }
  0x18   :  { %213 = vmatpush.bf16.msra.mxu2 %v302_v32 }
  0x1c   :  { %214 = vmatpush.bf16.msra.mxu2 %v301_v33 }
  0x20   :  { %215 = vmatpush.bf16.msra.mxu2 %v300_v34 }
  0x24   :  { %216 = vmatpush.bf16.msra.mxu2 %v299_v37 }
  0x89   :  { %v117_v35 = vpop.f32.mrf.mxu1 }
  0x8a   :  { %v122_v36 = vmin.f32 %v117_v35, 20.0  ;;  %v84_v50 = vpop.f32.mrf.mxu0 }
  0x8c   :  { %v124_v38 = vmul.f32 1.442695, %v122_v36 }
  0x8e   :  { %322 = vpow2.f32 %v124_v38 }
  0x91   :  { %v119_v39 = vpop.f32.mrf.mxu1 }
  0x92   :  { %v123_v40 = vmin.f32 %v119_v39, 20.0  ;;  %v86_v59 = vpop.f32.mrf.mxu0 }
  0x94   :  { %v323_v41 = vpop.eup %322  ;;  %v126_v42 = vmul.f32 1.442695, %v123_v40 }
  0x95   :  { %v128_v43 = vadd.f32 1.0, %v323_v41 }
  0x96   :  { %324 = vpow2.f32 %v126_v42 }
  0x97   :  { %v130_v44 = vmul.f32 %v128_v43, %v128_v43 }
  0x99   :  { %v136_v45 = vadd.f32 1.0, %v130_v44  ;;  %v261_v51 = vadd.f32 -1.0, %v130_v44 }
  0x9b   :  { %326 = vrcp.f32 %v136_v45  ;;  %v134_v54 = vmul.f32 %v261_v51, %v117_v35 }
  0x9c   :  { %v325_v46 = vpop.eup %324 }
  0x9d   :  { %v129_v47 = vadd.f32 1.0, %v325_v46 }
  0x9f   :  { %v131_v48 = vmul.f32 %v129_v47, %v129_v47 }
  0xa1   :  { %v137_v49 = vadd.f32 1.0, %v131_v48  ;;  %v262_v52 = vadd.f32 -1.0, %v131_v48  ;;  %v327_v53 = vpop.eup %326 }
  0xa2   :  { %v140_v56 = vmul.f32 %v327_v53, %v134_v54 }
  0xa3   :  { %328 = vrcp.f32 %v137_v49  ;;  %v135_v55 = vmul.f32 %v262_v52, %v119_v39 }
  0xa4   :  { %v142_v60 = vmul.f32 %v140_v56, %v84_v50 }
  0xa9   :  { %v329_v57 = vpop.eup %328 }
  0xaa   :  { %v141_v58 = vmul.f32 %v329_v57, %v135_v55 }
  0xac   :  { %v143_v61 = vmul.f32 %v141_v58, %v86_v59 }
  0xae   :  { %v144_v62 = vpack.c.bf16 %v143_v61, %v142_v60 }
  0xb0   :  { %217 = vmatmul.bf16.vlgmr.msra.gmra.mxu2 %v144_v62 }
 0x133   :  { %v218_v63 = vpop.f32.mrf.mxu2 }
 0x134   :  { %223 = vst.msk [vmem:[#allocation2] sm:$0xff] %vm71_vm0, %v218_v63 }
 0x13b   :  { %v220_v0 = vpop.f32.mrf.mxu2 }
 0x13c   :  { %224 = vst.msk [vmem:[#allocation2 + $0x8] sm:$0xff] %vm71_vm0, %v220_v0 }
 0x13d   :  { %237 = dma.vmem_to_hbm [thread:$0]  %s230_s28, 256, %s232_s7, [#allocation3], %s357_s8, %s357_s8, %s358_s4  }
 0x13e   :  { %354 = dma.done.wait [#allocation3], 256  }
 0x13f   :  { %355 = vsyncadd [#allocation3], 4294967040 }
 0x140   :  { %242 = vsyncpa [#allocation3], 1 }

</bundles_post_ra>
